<compile_context>
chip_gen: v7x
topology: tpu7x:2x2x1
jax: 0.10.0
libtpu: 0.0.40
codegen_flags: <defaults>
</compile_context>

<pallas_src>
import functools

import jax
import jax.numpy as jnp
from jax.experimental import pallas as pl
from jax.experimental.pallas import tpu as pltpu

_LANE = 128


def _sublane_multiple(dtype) -> int:
    return {4: 8, 2: 16, 1: 32}.get(jnp.dtype(dtype).itemsize, 8)


def _ce_sum_kernel(preds_ref, targets_ref, out_ref, acc_ref, *,
                   n_rows, tile_rows, tiles_per_part, tile_stride):
    """Grid step (p, j): partial cross-entropy sum for one (tile_rows, C) block.

    Partition p processes tiles [p*tile_stride, p*tile_stride + tiles_per_part)
    but only *owns* rows in [p*tiles_per_part*tile_rows, n_rows); rows outside
    that window (duplicated overlap tiles or the ragged/garbage tail of a
    partial last block) are masked to zero before accumulation.
    """
    p = pl.program_id(0)
    j = pl.program_id(1)

    @pl.when(j == 0)
    def _init():
        acc_ref[...] = jnp.zeros_like(acc_ref)

    x = preds_ref[...].astype(jnp.float32)          # (tile_rows, C) logits
    t = targets_ref[...]                            # (tile_rows, 1) int32 labels
    tr, c = x.shape

    # Numerically stable per-row logsumexp (classes on the lane axis).
    m = jnp.max(x, axis=-1, keepdims=True)                                  # (tr, 1)
    lse = jnp.log(jnp.sum(jnp.exp(x - m), axis=-1, keepdims=True)) + m      # (tr, 1)

    # Gather the target logit via a one-hot compare against a lane iota.
    class_ids = jax.lax.broadcasted_iota(jnp.int32, (tr, c), 1)             # (tr, C)
    tgt = jnp.sum(jnp.where(class_ids == t, x, 0.0), axis=-1, keepdims=True)  # (tr, 1)

    # Ownership / validity mask.  Garbage data on masked rows (partial last
    # block, duplicated overlap tile) may produce NaN/Inf in lse; the select
    # discards it, so this mask must stay applied right here.
    row_base = (p * tile_stride + j) * tile_rows
    row_ids = jax.lax.broadcasted_iota(jnp.int32, (tr, 1), 0) + row_base
    lower = p * (tiles_per_part * tile_rows)
    valid = (row_ids >= lower) & (row_ids < n_rows)
    per_row = jnp.where(valid, lse - tgt, 0.0)                              # (tr, 1)

    acc_ref[...] += per_row

    @pl.when(j == pl.num_programs(1) - 1)
    def _finalize():
        out_ref[...] = jnp.broadcast_to(jnp.sum(acc_ref[...]), out_ref.shape)


def mil_loss(preds_cls, targets_cls, lambda_bag=1.0, *, tile_rows=None):
    """Pallas implementation of MIL_Loss.forward.

    Args:
      preds_cls:   (N, C) float logits (f32 or bf16).
      targets_cls: (N,)   int class indices.
      lambda_bag:  scalar weight (applied in the wrapper; no recompile).
      tile_rows:   optional row-tile override.

    Returns:
      dict with key 'loss' holding a scalar float32.
    """
    n, c = preds_cls.shape
    sub = _sublane_multiple(preds_cls.dtype)

    if tile_rows is None:
        # Size by lane-padded VMEM bytes (a (tr, C) block occupies
        # tr * ceil(C/128)*128 * itemsize bytes in VMEM).  Target ~4 MiB per
        # preds buffer: double-buffered preds + targets + the (tr,1) scratch
        # stay well under the 48 MiB scoped budget (v7x-safe).
        padded_c = ((c + _LANE - 1) // _LANE) * _LANE
        row_bytes_vmem = padded_c * jnp.dtype(preds_cls.dtype).itemsize
        tile_rows = (4 * 1024 * 1024) // max(1, row_bytes_vmem)
        tile_rows = min(tile_rows, 16384)
    tile_rows = max(sub, (int(tile_rows) // sub) * sub)
    # Never taller than the (sublane-rounded) batch.
    n_ceil = ((n + sub - 1) // sub) * sub
    tile_rows = min(tile_rows, n_ceil)

    num_tiles = (n + tile_rows - 1) // tile_rows
    num_parts = 2 if num_tiles >= 2 else 1           # 2 TCs on v7x; harmless elsewhere
    tiles_per_part = (num_tiles + num_parts - 1) // num_parts
    tile_stride = num_tiles - tiles_per_part          # partition-1 base tile (in-bounds)

    targets = targets_cls.astype(jnp.int32).reshape(n, 1)

    kernel = functools.partial(
        _ce_sum_kernel, n_rows=n, tile_rows=tile_rows,
        tiles_per_part=tiles_per_part, tile_stride=tile_stride)

    in_idx = lambda p, j: (p * tile_stride + j, 0)    # affine, always in-bounds

    partial_sums = pl.pallas_call(
        kernel,
        out_shape=jax.ShapeDtypeStruct((num_parts, 1, 1), jnp.float32),
        grid=(num_parts, tiles_per_part),
        in_specs=[
            pl.BlockSpec((tile_rows, c), in_idx),     # preds row tile
            pl.BlockSpec((tile_rows, 1), in_idx),     # matching targets tile
        ],
        out_specs=pl.BlockSpec((1, 1, 1), lambda p, j: (p, 0, 0)),  # per-partition acc
        scratch_shapes=[pltpu.VMEM((tile_rows, 1), jnp.float32)],
        compiler_params=pltpu.CompilerParams(
            dimension_semantics=("parallel", "arbitrary"),
            vmem_limit_bytes=48 * 1024 * 1024,
        ),
    )(preds_cls, targets)

    loss = (jnp.sum(partial_sums) * (1.0 / n)) * jnp.asarray(lambda_bag, jnp.float32)
    return {"loss": loss}


if __name__ == "__main__":
    key = jax.random.PRNGKey(0)
    k1, k2 = jax.random.split(key)

    # Small bag-classification problem: 200 bags, 32 classes.
    N, C = 200, 32
    preds = jax.random.normal(k1, (N, C), dtype=jnp.float32)
    targets = jax.random.randint(k2, (N,), 0, C, dtype=jnp.int32)
    lam = 0.5

    # Pure-JAX reference of F.cross_entropy (mean reduction) * lambda_bag.
    ref = lam * jnp.mean(
        jax.nn.logsumexp(preds, axis=-1)
        - jnp.take_along_axis(preds, targets[:, None], axis=-1)[:, 0]
    )

    # 1) Auto tile size (single tile, single partition).
    loss_a = jax.block_until_ready(mil_loss(preds, targets, lambda_bag=lam)["loss"])
    assert jnp.allclose(loss_a, ref, atol=1e-5, rtol=1e-5), (loss_a, ref)

    # 2) Forced small tiles: 5 tiles -> 2 partitions with an overlapping
    #    ownership-masked tile plus a ragged (partial) last block.
    loss_b = jax.block_until_ready(
        mil_loss(preds, targets, lambda_bag=lam, tile_rows=48)["loss"])
    assert jnp.allclose(loss_b, ref, atol=1e-5, rtol=1e-5), (loss_b, ref)

    print("KERNEL_OK")
</pallas_src>

<mosaic_0001>
module attributes {stable_mosaic.version = 11 : i64} {
  func.func @_ce_sum_kernel(%arg0: i32, %arg1: i32, %arg2: memref<200x32xf32, #tpu.memory_space<vmem>>, %arg3: memref<200x1xi32, #tpu.memory_space<vmem>>, %arg4: memref<1x1x1xf32, #tpu.memory_space<vmem>>, %arg5: memref<200x1xf32, #tpu.memory_space<vmem>>) attributes {dimension_semantics = [#tpu.dimension_semantics<parallel>, #tpu.dimension_semantics<arbitrary>], iteration_bounds = array<i64: 1, 1>, scalar_prefetch = 0 : i64, scratch_operands = 1 : i64, tpu.core_type = #tpu.core_type<tc>, window_params = [{transform_indices = @transform_0, window_bounds = array<i64: 200, 32>}, {transform_indices = @transform_1, window_bounds = array<i64: 200, 1>}, {transform_indices = @transform_2, window_bounds = array<i64: 1, 1, 1>}]} {
    %c0_i32 = arith.constant 0 : i32
    %0 = arith.cmpi eq, %arg1, %c0_i32 : i32
    %1 = arith.extui %0 : i1 to i32
    %c0_i32_0 = arith.constant 0 : i32
    %2 = arith.cmpi ne, %1, %c0_i32_0 : i32
    scf.if %2 {
      %cst_17 = arith.constant 0.000000e+00 : f32
      %42 = vector.broadcast %cst_17 : f32 to vector<200x1xf32>
      %c0_18 = arith.constant 0 : index
      %c0_19 = arith.constant 0 : index
      %43 = vector.load %arg5[%c0_18, %c0_19] : memref<200x1xf32, #tpu.memory_space<vmem>>, vector<200x1xf32>
      tpu.vector_store %arg5[%c0_18, %c0_19], %42 {strides = array<i32>} : memref<200x1xf32, #tpu.memory_space<vmem>>, vector<200x1xf32>,
    } else {
    }
    %c0 = arith.constant 0 : index
    %c0_1 = arith.constant 0 : index
    %3 = vector.load %arg2[%c0, %c0_1] : memref<200x32xf32, #tpu.memory_space<vmem>>, vector<200x32xf32>
    %c0_2 = arith.constant 0 : index
    %c0_3 = arith.constant 0 : index
    %4 = vector.load %arg3[%c0_2, %c0_3] : memref<200x1xi32, #tpu.memory_space<vmem>>, vector<200x1xi32>
    %cst = arith.constant dense<0xFF800000> : vector<200xf32>
    %5 = vector.multi_reduction <maximumf>, %3, %cst [1] : vector<200x32xf32> to vector<200xf32>
    %6 = vector.shape_cast %5 : vector<200xf32> to vector<200x1xf32>
    %7 = vector.broadcast %6 : vector<200x1xf32> to vector<200x32xf32>
    %8 = arith.subf %3, %7 : vector<200x32xf32>
    %9 = math.exp %8 : vector<200x32xf32>
    %cst_4 = arith.constant dense<0.000000e+00> : vector<200xf32>
    %10 = vector.multi_reduction <add>, %9, %cst_4 [1] : vector<200x32xf32> to vector<200xf32>
    %11 = vector.shape_cast %10 : vector<200xf32> to vector<200x1xf32>
    %12 = math.log %11 : vector<200x1xf32>
    %13 = arith.addf %12, %6 : vector<200x1xf32>
    %14 = tpu.iota {dimensions = array<i32: 1>} : vector<200x32xi32>
    %15 = vector.broadcast %4 : vector<200x1xi32> to vector<200x32xi32>
    %16 = arith.cmpi eq, %14, %15 : vector<200x32xi32>
    %cst_5 = arith.constant 0.000000e+00 : f32
    %17 = vector.broadcast %cst_5 : f32 to vector<200x32xf32>
    %18 = arith.select %16, %3, %17 : vector<200x32xi1>, vector<200x32xf32>
    %cst_6 = arith.constant dense<0.000000e+00> : vector<200xf32>
    %19 = vector.multi_reduction <add>, %18, %cst_6 [1] : vector<200x32xf32> to vector<200xf32>
    %20 = vector.shape_cast %19 : vector<200xf32> to vector<200x1xf32>
    %c0_i32_7 = arith.constant 0 : i32
    %21 = arith.muli %arg0, %c0_i32_7 : i32
    %22 = arith.addi %21, %arg1 : i32
    %c200_i32 = arith.constant 200 : i32
    %23 = arith.muli %22, %c200_i32 : i32
    %24 = tpu.iota {dimensions = array<i32: 0>} : vector<200x1xi32>
    %25 = vector.broadcast %23 : i32 to vector<200x1xi32>
    %26 = arith.addi %24, %25 : vector<200x1xi32>
    %c200_i32_8 = arith.constant 200 : i32
    %27 = arith.muli %arg0, %c200_i32_8 : i32
    %28 = vector.broadcast %27 : i32 to vector<200x1xi32>
    %29 = arith.cmpi sge, %26, %28 : vector<200x1xi32>
    %c200_i32_9 = arith.constant 200 : i32
    %30 = vector.broadcast %c200_i32_9 : i32 to vector<200x1xi32>
    %31 = arith.cmpi slt, %26, %30 : vector<200x1xi32>
    %32 = arith.andi %29, %31 : vector<200x1xi1>
    %33 = arith.subf %13, %20 : vector<200x1xf32>
    %cst_10 = arith.constant 0.000000e+00 : f32
    %34 = vector.broadcast %cst_10 : f32 to vector<200x1xf32>
    %35 = arith.select %32, %33, %34 : vector<200x1xi1>, vector<200x1xf32>
    %c0_11 = arith.constant 0 : index
    %c0_12 = arith.constant 0 : index
    %36 = vector.load %arg5[%c0_11, %c0_12] : memref<200x1xf32, #tpu.memory_space<vmem>>, vector<200x1xf32>
    %37 = arith.addf %36, %35 : vector<200x1xf32>
    %c0_13 = arith.constant 0 : index
    %c0_14 = arith.constant 0 : index
    %38 = vector.load %arg5[%c0_13, %c0_14] : memref<200x1xf32, #tpu.memory_space<vmem>>, vector<200x1xf32>
    tpu.vector_store %arg5[%c0_13, %c0_14], %37 {strides = array<i32>} : memref<200x1xf32, #tpu.memory_space<vmem>>, vector<200x1xf32>,
    %c0_i32_15 = arith.constant 0 : i32
    %39 = arith.cmpi eq, %arg1, %c0_i32_15 : i32
    %40 = arith.extui %39 : i1 to i32
    %c0_i32_16 = arith.constant 0 : i32
    %41 = arith.cmpi ne, %40, %c0_i32_16 : i32
    scf.if %41 {
      %c0_17 = arith.constant 0 : index
      %c0_18 = arith.constant 0 : index
      %42 = vector.load %arg5[%c0_17, %c0_18] : memref<200x1xf32, #tpu.memory_space<vmem>>, vector<200x1xf32>
      %43 = vector.shape_cast %42 : vector<200x1xf32> to vector<1x200x1xf32>
      %cst_19 = arith.constant dense<0.000000e+00> : vector<1xf32>
      %44 = vector.multi_reduction <add>, %43, %cst_19 [1, 2] : vector<1x200x1xf32> to vector<1xf32>
      %45 = vector.shape_cast %44 : vector<1xf32> to vector<1x1x1xf32>
      %46 = vector.extract %45[0, 0, 0] : f32 from vector<1x1x1xf32>
      %47 = vector.broadcast %46 : f32 to vector<1x1x1xf32>
      %c0_20 = arith.constant 0 : index
      %c0_21 = arith.constant 0 : index
      %c0_22 = arith.constant 0 : index
      %48 = vector.load %arg4[%c0_20, %c0_21, %c0_22] : memref<1x1x1xf32, #tpu.memory_space<vmem>>, vector<1x1x1xf32>
      tpu.vector_store %arg4[%c0_20, %c0_21, %c0_22], %47 {strides = array<i32>} : memref<1x1x1xf32, #tpu.memory_space<vmem>>, vector<1x1x1xf32>,
    } else {
    }
    return
  }
  func.func @transform_0(%arg0: i32, %arg1: i32) -> (i32, i32) {
    %c0_i32 = arith.constant 0 : i32
    %0 = arith.muli %arg0, %c0_i32 : i32
    %1 = arith.addi %0, %arg1 : i32
    %c0_i32_0 = arith.constant 0 : i32
    %c0_i32_1 = arith.constant 0 : i32
    return %1, %c0_i32_0 : i32, i32
  }
  func.func @transform_1(%arg0: i32, %arg1: i32) -> (i32, i32) {
    %c0_i32 = arith.constant 0 : i32
    %0 = arith.muli %arg0, %c0_i32 : i32
    %1 = arith.addi %0, %arg1 : i32
    %c0_i32_0 = arith.constant 0 : i32
    %c0_i32_1 = arith.constant 0 : i32
    return %1, %c0_i32_0 : i32, i32
  }
  func.func @transform_2(%arg0: i32, %arg1: i32) -> (i32, i32, i32) {
    %c0_i32 = arith.constant 0 : i32
    %c0_i32_0 = arith.constant 0 : i32
    %c0_i32_1 = arith.constant 0 : i32
    return %arg0, %c0_i32, %c0_i32_0 : i32, i32, i32
  }
}

</mosaic_0001>

<bundles_post_ra>
// kernel: tpu_custom_call.1
= control target key start
LH: loop header
LB: loop body
LE: loop exit
PB: predicated region body
PF: predicated region fallthrough
CT: control target
= control target key end

     0   :  { %vm92_vm0 = vcmask 261120   ;;  %v1085_v6 = vmov 0   ;;  %s1679_s0 = inlined_call_operand.vmem [shape: f32[200,32], index: 0, kind: input, shape index: {}]   ;;  %s1680_s1 = inlined_call_operand.vmem [shape: s32[200,1], index: 1, kind: input, shape index: {}]   ;;  %s1681_s2 = inlined_call_operand.hbm [shape: f32[1,1,1], index: 2, kind: output, shape index: {}]  }
   0x1   :  { %v1106_v0 = vld [vmem:[%s1679_s0 + $0x10] sm:$0xff]  ;;  %v1111_v1 = vld [vmem:[%s1679_s0] sm:$0xff]  ;;  %v1116_v2 = vld [vmem:[%s1679_s0 + $0x18] sm:$0xff]  ;;  %959 = vset.pattern.permute.xlu1 %v1085_v6  ;;  %960 = vset.pattern.permute.xlu0 %v1085_v6 }
   0x2   :  { %v99_v3 = vsel %vm92_vm0, %v1106_v0, -inf  ;;  %v93_v4 = vsel %vm92_vm0, %v1111_v1, -inf  ;;  %v1125_v5 = vld [vmem:[%s1679_s0 + $0x8] sm:$0xff]  ;;  %v102_v7 = vsel %vm92_vm0, %v1116_v2, -inf  ;;  %v1139_v10 = vld [vmem:[%s1679_s0 + $0x20] sm:$0xff]  ;;  %v1148_v13 = vld [vmem:[%s1679_s0 + $0x38] sm:$0xff] }
   0x3   :  { %100 = vmax.xlane.f32.xlu1 %v99_v3  ;;  %94 = vmax.xlane.f32.xlu0 %v93_v4  ;;  %v96_v8 = vsel %vm92_vm0, %v1125_v5, -inf  ;;  %v1134_v9 = vld [vmem:[%s1679_s0 + $0x28] sm:$0xff]  ;;  %v105_v12 = vsel %vm92_vm0, %v1139_v10, -inf  ;;  %v1153_v14 = vld [vmem:[%s1679_s0 + $0x30] sm:$0xff]  ;;  %v114_v15 = vsel %vm92_vm0, %v1148_v13, -inf  ;;  %v1167_v18 = vld [vmem:[%s1679_s0 + $0x40] sm:$0xff] }
   0x4   :  { %v108_v11 = vsel %vm92_vm0, %v1134_v9, -inf  ;;  %v111_v16 = vsel %vm92_vm0, %v1153_v14, -inf  ;;  %v1162_v17 = vld [vmem:[%s1679_s0 + $0x48] sm:$0xff]  ;;  %v117_v20 = vsel %vm92_vm0, %v1167_v18, -inf  ;;  %v1176_v21 = vld [vmem:[%s1679_s0 + $0x58] sm:$0xff]  ;;  %v1181_v22 = vld [vmem:[%s1679_s0 + $0x50] sm:$0xff] }
   0x5   :  { %v120_v19 = vsel %vm92_vm0, %v1162_v17, -inf }
   0x7   :  { %103 = vmax.xlane.f32.xlu1 %v102_v7  ;;  %97 = vmax.xlane.f32.xlu0 %v96_v8 }
   0xb   :  { %109 = vmax.xlane.f32.xlu1 %v108_v11  ;;  %106 = vmax.xlane.f32.xlu0 %v105_v12 }
   0xf   :  { %115 = vmax.xlane.f32.xlu1 %v114_v15  ;;  %112 = vmax.xlane.f32.xlu0 %v111_v16 }
  0x10   :  { %7 = vsyncpa [#allocation4], 0  ;;  %v126_v23 = vsel %vm92_vm0, %v1176_v21, -inf  ;;  %v123_v24 = vsel %vm92_vm0, %v1181_v22, -inf  ;;  %v1190_v25 = vld [vmem:[%s1679_s0 + $0x68] sm:$0xff]  ;;  %v1195_v26 = vld [vmem:[%s1679_s0 + $0x60] sm:$0xff] }
  0x11   :  { %v132_v27 = vsel %vm92_vm0, %v1190_v25, -inf  ;;  %v129_v28 = vsel %vm92_vm0, %v1195_v26, -inf  ;;  %v1204_v29 = vld [vmem:[%s1679_s0 + $0x78] sm:$0xff]  ;;  %v1209_v30 = vld [vmem:[%s1679_s0 + $0x70] sm:$0xff]  ;;  %v1218_v33 = vld [vmem:[%s1679_s0 + $0x88] sm:$0xff]  ;;  %vm16_vm5 = vcmask 7168  }
  0x12   :  { %v138_v31 = vsel %vm92_vm0, %v1204_v29, -inf  ;;  %v135_v32 = vsel %vm92_vm0, %v1209_v30, -inf  ;;  %v1223_v34 = vld [vmem:[%s1679_s0 + $0x80] sm:$0xff]  ;;  %v144_v35 = vsel %vm92_vm0, %v1218_v33, -inf  ;;  %v1232_v37 = vld [vmem:[%s1679_s0 + $0x98] sm:$0xff]  ;;  %v1237_v38 = vld [vmem:[%s1679_s0 + $0x90] sm:$0xff] }
  0x13   :  { %121 = vmax.xlane.f32.xlu1 %v120_v19  ;;  %118 = vmax.xlane.f32.xlu0 %v117_v20  ;;  %v141_v36 = vsel %vm92_vm0, %v1223_v34, -inf  ;;  %v150_v39 = vsel %vm92_vm0, %v1232_v37, -inf  ;;  %v147_v40 = vsel %vm92_vm0, %v1237_v38, -inf  ;;  %v1246_v41 = vld [vmem:[%s1679_s0 + $0xa8] sm:$0xff]  ;;  %v1251_v42 = vld [vmem:[%s1679_s0 + $0xa0] sm:$0xff]  ;;  %v1260_v45 = vld [vmem:[%s1679_s0 + $0xb8] sm:$0xff] }
  0x14   :  { %v156_v43 = vsel %vm92_vm0, %v1246_v41, -inf  ;;  %v153_v44 = vsel %vm92_vm0, %v1251_v42, -inf  ;;  %v1265_v46 = vld [vmem:[%s1679_s0 + $0xb0] sm:$0xff]  ;;  %v162_v47 = vsel %vm92_vm0, %v1260_v45, -inf  ;;  %v1274_v49 = vld [vmem:[%s1679_s0 + $0xc0] sm:$0xff]  ;;  %v70_v52 = vld [vmem:[%s1680_s1 + $0x18] sm:$0xff] }
  0x15   :  { %v159_v48 = vsel %vm92_vm0, %v1265_v46, -inf  ;;  %v165_v50 = vsel %vm92_vm0, %v1274_v49, -inf  ;;  %v67_v51 = vld [vmem:[%s1680_s1] sm:$0xff]  ;;  %v72_v53 = vld [vmem:[%s1680_s1 + $0x28] sm:$0xff]  ;;  %v74_v55 = vld [vmem:[%s1680_s1 + $0x38] sm:$0xff] }
  0x16   :  { %v68_v54 = vld [vmem:[%s1680_s1 + $0x8] sm:$0xff]  ;;  %v69_v56 = vld [vmem:[%s1680_s1 + $0x10] sm:$0xff]  ;;  %v75_v57 = vld [vmem:[%s1680_s1 + $0x40] sm:$0xff] }
  0x17   :  { %127 = vmax.xlane.f32.xlu1 %v126_v23  ;;  %124 = vmax.xlane.f32.xlu0 %v123_v24  ;;  %v71_v58 = vld [vmem:[%s1680_s1 + $0x20] sm:$0xff]  ;;  %v76_v59 = vld [vmem:[%s1680_s1 + $0x48] sm:$0xff]  ;;  %v73_v60 = vld [vmem:[%s1680_s1 + $0x30] sm:$0xff] }
  0x18   :  { %v77_v61 = vld [vmem:[%s1680_s1 + $0x50] sm:$0xff]  ;;  %v79_v62 = vld [vmem:[%s1680_s1 + $0x60] sm:$0xff]  ;;  %v78_v63 = vld [vmem:[%s1680_s1 + $0x58] sm:$0xff] }
  0x19   :  { %v85_v3 = vld [vmem:[%s1680_s1 + $0x90] sm:$0xff]  ;;  %v80_v4 = vld [vmem:[%s1680_s1 + $0x68] sm:$0xff]  ;;  %v87_v6 = vld [vmem:[%s1680_s1 + $0xa0] sm:$0xff] }
  0x1a   :  { %v81_v7 = vld [vmem:[%s1680_s1 + $0x70] sm:$0xff]  ;;  %v82_v11 = vld [vmem:[%s1680_s1 + $0x78] sm:$0xff]  ;;  %v91_v12 = vld [vmem:[%s1680_s1 + $0xc0] sm:$0xff] }
  0x1b   :  { %133 = vmax.xlane.f32.xlu1 %v132_v27  ;;  %130 = vmax.xlane.f32.xlu0 %v129_v28  ;;  %v89_v8 = vld [vmem:[%s1680_s1 + $0xb0] sm:$0xff]  ;;  %v83_v15 = vld [vmem:[%s1680_s1 + $0x80] sm:$0xff]  ;;  %v84_v16 = vld [vmem:[%s1680_s1 + $0x88] sm:$0xff] }
  0x1c   :  { %v86_v19 = vld [vmem:[%s1680_s1 + $0x98] sm:$0xff]  ;;  %v88_v20 = vld [vmem:[%s1680_s1 + $0xa8] sm:$0xff] }
  0x1d   :  { %v90_v23 = vld [vmem:[%s1680_s1 + $0xb8] sm:$0xff]  ;;  %s1087_s1 = smov [#allocation3]  }
  0x1e   :  { %s946_s23 = sshll.u32 %s1087_s1, 4  ;;  %s947_s23 = int_to_ptr.vmem [resolvable:$true] %s946_s23 }
  0x1f   :  { %139 = vmax.xlane.f32.xlu1 %v138_v31  ;;  %136 = vmax.xlane.f32.xlu0 %v135_v32  ;;  %s1061_s25 = scalar_lea.vmem %s947_s23, 16  ;;  %s1065_s26 = scalar_lea.vmem %s947_s23, 32 }
  0x20   :  { %p1062_p0 = scmp.ne.s32.totalorder %s947_s23, %s1061_s25  ;;  %p1066_p1 = scmp.lt.s32.totalorder %s947_s23, %s947_s23 }
  0x21   :  { %p1067_p2 = scmp.lt.s32.totalorder %s1065_s26, %s1061_s25 }
  0x23   :  { %145 = vmax.xlane.f32.xlu1 %v144_v35  ;;  %142 = vmax.xlane.f32.xlu0 %v141_v36  ;;  %p1068_p3 = por %p1067_p2, %p1066_p1 }
  0x25   :  { %p1069_p4 = pnand %p1068_p3, %p1062_p0 }
  0x27   :  { %151 = vmax.xlane.f32.xlu1 %v150_v39  ;;  %148 = vmax.xlane.f32.xlu0 %v147_v40 }
  0x2b   :  { %157 = vmax.xlane.f32.xlu1 %v156_v43  ;;  %154 = vmax.xlane.f32.xlu0 %v153_v44 }
  0x2f   :  { %163 = vmax.xlane.f32.xlu1 %v162_v47  ;;  %160 = vmax.xlane.f32.xlu0 %v159_v48 }
  0x33   :  { %166 = vmax.xlane.f32.xlu0 %v165_v50 }
  0x40   :  { %396 = vperm.xlu1 %959, %v67_v51  }
  0x44   :  { %405 = vperm.xlu1 %959, %v70_v52  }
  0x48   :  { %411 = vperm.xlu1 %959, %v72_v53  }
  0x49   :  { %399 = vperm.xlu0 %960, %v68_v54  }
  0x4c   :  { %417 = vperm.xlu1 %959, %v74_v55  }
  0x4d   :  { %402 = vperm.xlu0 %960, %v69_v56  }
  0x50   :  { %420 = vperm.xlu1 %959, %v75_v57  }
  0x51   :  { %408 = vperm.xlu0 %960, %v71_v58  }
  0x54   :  { %423 = vperm.xlu1 %959, %v76_v59  }
  0x55   :  { %414 = vperm.xlu0 %960, %v73_v60  }
  0x58   :  { %426 = vperm.xlu1 %959, %v77_v61  }
  0x59   :  { %432 = vperm.xlu0 %960, %v79_v62  }
  0x5c   :  { %429 = vperm.xlu1 %959, %v78_v63  }
  0x5d   :  { %450 = vperm.xlu0 %960, %v85_v3  }
  0x60   :  { %435 = vperm.xlu1 %959, %v80_v4  }
  0x61   :  { %456 = vperm.xlu0 %960, %v87_v6  }
  0x64   :  { %438 = vperm.xlu1 %959, %v81_v7  }
  0x65   :  { %462 = vperm.xlu0 %960, %v89_v8  }
  0x68   :  { %441 = vperm.xlu1 %959, %v82_v11  }
  0x69   :  { %468 = vperm.xlu0 %960, %v91_v12  }
  0x6c   :  { %444 = vperm.xlu1 %959, %v83_v15  }
  0x70   :  { %447 = vperm.xlu1 %959, %v84_v16  }
  0x74   :  { %453 = vperm.xlu1 %959, %v86_v19  }
  0x78   :  { %459 = vperm.xlu1 %959, %v88_v20  }
  0x7c   :  { %465 = vperm.xlu1 %959, %v90_v23  }
  0x90   :  { %v1353_v24 = vpop.xlane.xlu1 %100  ;;  %v1355_v27 = vpop.xlane.xlu0 %94 }
  0x91   :  { %v168_v28 = vsub.f32 %v1111_v1, %v1355_v27  ;;  %v170_v32 = vsub.f32 %v1106_v0, %v1353_v24 }
  0x93   :  { %v193_v31 = vmul.f32 1.442695, %v168_v28  ;;  %v197_v47 = vmul.f32 1.442695, %v170_v32 }
  0x94   :  { %v1361_v35 = vpop.xlane.xlu1 %103  ;;  %v1363_v36 = vpop.xlane.xlu0 %97 }
  0x95   :  { %v171_v39 = vsub.f32 %v1116_v2, %v1361_v35  ;;  %v169_v40 = vsub.f32 %v1125_v5, %v1363_v36  ;;  %961 = vpow2.f32 %v193_v31 }
  0x97   :  { %v199_v43 = vmul.f32 1.442695, %v171_v39  ;;  %v195_v44 = vmul.f32 1.442695, %v169_v40 }
  0x98   :  { %v1369_v48 = vpop.xlane.xlu1 %109  ;;  %v1371_v50 = vpop.xlane.xlu0 %106 }
  0x99   :  { %963 = vpow2.f32 %v199_v43  ;;  %v173_v51 = vsub.f32 %v1134_v9, %v1369_v48  ;;  %v172_v52 = vsub.f32 %v1139_v10, %v1371_v50 }
  0x9a   :  { %965 = vpow2.f32 %v195_v44 }
  0x9b   :  { %v203_v53 = vmul.f32 1.442695, %v173_v51  ;;  %967 = vpow2.f32 %v197_v47  ;;  %v201_v54 = vmul.f32 1.442695, %v172_v52 }
  0x9c   :  { %v1377_v55 = vpop.xlane.xlu1 %115  ;;  %v1379_v56 = vpop.xlane.xlu0 %112 }
  0x9d   :  { %969 = vpow2.f32 %v203_v53  ;;  %v175_v57 = vsub.f32 %v1148_v13, %v1377_v55  ;;  %v174_v58 = vsub.f32 %v1153_v14, %v1379_v56 }
  0x9e   :  { %971 = vpow2.f32 %v201_v54 }
  0x9f   :  { %v207_v59 = vmul.f32 1.442695, %v175_v57  ;;  %v962_v60 = vpop.eup %961  ;;  %v205_v61 = vmul.f32 1.442695, %v174_v58 }
  0xa0   :  { %v1385_v62 = vpop.xlane.xlu1 %121  ;;  %v1387_v63 = vpop.xlane.xlu0 %118  ;;  %v243_v4 = vsel %vm92_vm0, %v962_v60, 0.0 }
  0xa1   :  { %973 = vpow2.f32 %v207_v59  ;;  %v176_v3 = vsub.f32 %v1167_v18, %v1387_v63  ;;  %244 = vadd.xlane.f32.xlu1 %v243_v4  ;;  %v177_v59 = vsub.f32 %v1162_v17, %v1385_v62 }
  0xa2   :  { %975 = vpow2.f32 %v205_v61 }
  0xa3   :  { %v964_v6 = vpop.eup %963  ;;  %v209_v8 = vmul.f32 1.442695, %v176_v3  ;;  %v211_v4 = vmul.f32 1.442695, %v177_v59 }
  0xa4   :  { %v966_v7 = vpop.eup %965  ;;  %v1392_v11 = vpop.xlane.xlu1 %127  ;;  %v252_v15 = vsel %vm92_vm0, %v964_v6, 0.0 }
  0xa5   :  { %v1394_v12 = vpop.xlane.xlu0 %124  ;;  %v246_v16 = vsel %vm92_vm0, %v966_v7, 0.0  ;;  %v968_v19 = vpop.eup %967  ;;  %253 = vadd.xlane.f32.xlu1 %v252_v15  ;;  %977 = vpow2.f32 %v209_v8  ;;  %v393_v15 = vlaneseq }
  0xa6   :  { %247 = vadd.xlane.f32.xlu0 %v246_v16  ;;  %v249_v32 = vsel %vm92_vm0, %v968_v19, 0.0  ;;  %v178_v6 = vsub.f32 %v1181_v22, %v1394_v12  ;;  %979 = vpow2.f32 %v211_v4  ;;  %v179_v16 = vsub.f32 %v1176_v21, %v1392_v11 }
  0xa7   :  { %v970_v20 = vpop.eup %969 }
  0xa8   :  { %v1398_v23 = vpop.xlane.xlu1 %133  ;;  %v258_v31 = vsel %vm92_vm0, %v970_v20, 0.0  ;;  %v972_v39 = vpop.eup %971  ;;  %v213_v19 = vmul.f32 1.442695, %v178_v6 }
  0xa9   :  { %v1400_v28 = vpop.xlane.xlu0 %130  ;;  %259 = vadd.xlane.f32.xlu1 %v258_v31  ;;  %v255_v51 = vsel %vm92_vm0, %v972_v39, 0.0  ;;  %v1432_v31 = vand.u32 127, %v393_v15 }
  0xaa   :  { %250 = vadd.xlane.f32.xlu0 %v249_v32  ;;  %v215_v32 = vmul.f32 1.442695, %v179_v16  ;;  %981 = vpow2.f32 %v213_v19  ;;  %v180_v39 = vsub.f32 %v1195_v26, %v1400_v28 }
  0xab   :  { %v974_v40 = vpop.eup %973 }
  0xac   :  { %v1404_v43 = vpop.xlane.xlu1 %139  ;;  %v264_v47 = vsel %vm92_vm0, %v974_v40, 0.0  ;;  %v976_v52 = vpop.eup %975  ;;  %983 = vpow2.f32 %v215_v32 }
  0xad   :  { %v1406_v44 = vpop.xlane.xlu0 %136  ;;  %265 = vadd.xlane.f32.xlu1 %v264_v47  ;;  %v261_v57 = vsel %vm92_vm0, %v976_v52, 0.0  ;;  %v217_v52 = vmul.f32 1.442695, %v180_v39  ;;  %v183_v39 = vsub.f32 %v1204_v29, %v1404_v43 }
  0xae   :  { %1683 = vst [vmem:[#allocation6_spill] sm:$0xff] %v1406_v44  ;;  %256 = vadd.xlane.f32.xlu0 %v255_v51  ;;  %v181_v51 = vsub.f32 %v1190_v25, %v1398_v23  ;;  %v182_v15 = vsub.f32 %v1209_v30, %v1406_v44 }
  0xaf   :  { %v978_v58 = vpop.eup %977  ;;  %985 = vpow2.f32 %v217_v52  ;;  %v223_v44 = vmul.f32 1.442695, %v183_v39 }
  0xb0   :  { %v1410_v53 = vpop.xlane.xlu1 %145  ;;  %v267_v3 = vsel %vm92_vm0, %v978_v58, 0.0  ;;  %v980_v59 = vpop.eup %979  ;;  %v219_v6 = vmul.f32 1.442695, %v181_v51 }
  0xb1   :  { %v1412_v54 = vpop.xlane.xlu0 %142  ;;  %v270_v16 = vsel %vm92_vm0, %v980_v59, 0.0 }
  0xb2   :  { %262 = vadd.xlane.f32.xlu0 %v261_v57  ;;  %987 = vpow2.f32 %v219_v6 }
  0xb4   :  { %v1417_v60 = vpop.xlane.xlu1 %151  ;;  %v982_v19 = vpop.eup %981 }
  0xb5   :  { %v1419_v61 = vpop.xlane.xlu0 %148  ;;  %v273_v52 = vsel %vm92_vm0, %v982_v19, 0.0 }
  0xb6   :  { %268 = vadd.xlane.f32.xlu0 %v267_v3 }
  0xb8   :  { %v1424_v7 = vpop.xlane.xlu1 %157 }
  0xb9   :  { %v1426_v8 = vpop.xlane.xlu0 %154 }
  0xbc   :  { %v1430_v20 = vpop.xlane.xlu1 %163 }
  0xbd   :  { %v1436_v40 = vpop.xlane.xlu0 %160 }
  0xc0   :  { %v397_v47 = vpop.permute.xlu1 %396 }
  0xc1   :  { %vm470_vm1 = vcmp.eq.s32.totalorder %v1432_v31, %v397_v47  ;;  %v1443_v3 = vpop.xlane.xlu0 %166  ;;  %v221_v47 = vmul.f32 1.442695, %v182_v15 }
  0xc2   :  { %v495_v57 = vsel %vm470_vm1, %v1111_v1, 0.0 }
  0xc3   :  { %v520_v58 = vsel %vm92_vm0, %v495_v57, 0.0  ;;  %989 = vpow2.f32 %v221_v47 }
  0xc4   :  { %v1445_v4 = vpop.permute.xlu1 %405  ;;  %521 = vadd.xlane.f32.xlu1 %v520_v58  ;;  %v984_v58 = vpop.eup %983  ;;  %991 = vpow2.f32 %v223_v44  ;;  %v186_v44 = vsub.f32 %v1237_v38, %v1419_v61 }
  0xc5   :  { %vm473_vm3 = vcmp.eq.s32.totalorder %v1432_v31, %v1445_v4  ;;  %v276_v15 = vsel %vm92_vm0, %v984_v58, 0.0 }
  0xc8   :  { %v1450_v32 = vpop.permute.xlu1 %411  ;;  %271 = vadd.xlane.f32.xlu1 %v270_v16  ;;  %v400_v1 = vpop.permute.xlu0 %399 }
  0xc9   :  { %vm471_vm2 = vcmp.eq.s32.totalorder %v1432_v31, %v400_v1  ;;  %v1086_v1 = vmov 0.0   ;;  %vm475_vm7 = vcmp.eq.s32.totalorder %v1432_v31, %v1450_v32  ;;  %v229_v32 = vmul.f32 1.442695, %v186_v44 }
  0xca   :  { %v496_v51 = vsel %vm471_vm2, %v1125_v5, 0.0  ;;  %v184_v5 = vsub.f32 %v1223_v34, %v1412_v54  ;;  %17 = vst.msk [vmem:[#allocation2] sm:$0xff] %vm16_vm5, %v1086_v1  ;;  %18 = vst.msk [vmem:[#allocation2 + $0x8] sm:$0xff] %vm16_vm5, %v1086_v1 }
  0xcb   :  { %v523_v57 = vsel %vm92_vm0, %v496_v51, 0.0  ;;  %19 = vst.msk [vmem:[#allocation2 + $0x10] sm:$0xff] %vm16_vm5, %v1086_v1  ;;  %20 = vst.msk [vmem:[#allocation2 + $0x18] sm:$0xff] %vm16_vm5, %v1086_v1  ;;  %v498_v51 = vsel %vm473_vm3, %v1116_v2, 0.0 }
  0xcc   :  { %v1458_v59 = vpop.permute.xlu1 %417  ;;  %274 = vadd.xlane.f32.xlu1 %v273_v52  ;;  %524 = vadd.xlane.f32.xlu0 %v523_v57  ;;  %v403_v16 = vpop.permute.xlu0 %402  ;;  %21 = vst.msk [vmem:[#allocation2 + $0x20] sm:$0xff] %vm16_vm5, %v1086_v1  ;;  %22 = vst.msk [vmem:[#allocation2 + $0x28] sm:$0xff] %vm16_vm5, %v1086_v1  ;;  %v185_v52 = vsub.f32 %v1218_v33, %v1410_v53  ;;  %v225_v57 = vmul.f32 1.442695, %v184_v5 }
  0xcd   :  { %vm472_vm4 = vcmp.eq.s32.totalorder %v1432_v31, %v403_v16  ;;  %23 = vst.msk [vmem:[#allocation2 + $0x30] sm:$0xff] %vm16_vm5, %v1086_v1  ;;  %24 = vst.msk [vmem:[#allocation2 + $0x38] sm:$0xff] %vm16_vm5, %v1086_v1  ;;  %v529_v16 = vsel %vm92_vm0, %v498_v51, 0.0  ;;  %v500_v51 = vsel %vm475_vm7, %v1134_v9, 0.0  ;;  %vm477_vm9 = vcmp.eq.s32.totalorder %v1432_v31, %v1458_v59 }
  0xce   :  { %v497_v6 = vsel %vm472_vm4, %v1106_v0, 0.0  ;;  %25 = vst.msk [vmem:[#allocation2 + $0x40] sm:$0xff] %vm16_vm5, %v1086_v1  ;;  %26 = vst.msk [vmem:[#allocation2 + $0x48] sm:$0xff] %vm16_vm5, %v1086_v1  ;;  %v986_v0 = vpop.eup %985  ;;  %v227_v2 = vmul.f32 1.442695, %v185_v52  ;;  %993 = vpow2.f32 %v225_v57  ;;  %v535_v57 = vsel %vm92_vm0, %v500_v51, 0.0 }
  0xcf   :  { %v526_v19 = vsel %vm92_vm0, %v497_v6, 0.0  ;;  %27 = vst.msk [vmem:[#allocation2 + $0x50] sm:$0xff] %vm16_vm5, %v1086_v1  ;;  %28 = vst.msk [vmem:[#allocation2 + $0x58] sm:$0xff] %vm16_vm5, %v1086_v1  ;;  %v279_v58 = vsel %vm92_vm0, %v986_v0, 0.0  ;;  %v988_v6 = vpop.eup %987 }
  0xd0   :  { %29 = vst.msk [vmem:[#allocation2 + $0x60] sm:$0xff] %vm16_vm5, %v1086_v1  ;;  %30 = vst.msk [vmem:[#allocation2 + $0x68] sm:$0xff] %vm16_vm5, %v1086_v1  ;;  %v421_v39 = vpop.permute.xlu1 %420  ;;  %277 = vadd.xlane.f32.xlu1 %v276_v15  ;;  %527 = vadd.xlane.f32.xlu0 %v526_v19  ;;  %v409_v47 = vpop.permute.xlu0 %408  ;;  %v282_v5 = vsel %vm92_vm0, %v988_v6, 0.0  ;;  %995 = vpow2.f32 %v227_v2  ;;  %v188_v6 = vsub.f32 %v1251_v42, %v1426_v8 }
  0xd1   :  { %31 = vst.msk [vmem:[#allocation2 + $0x70] sm:$0xff] %vm16_vm5, %v1086_v1  ;;  %32 = vst.msk [vmem:[#allocation2 + $0x78] sm:$0xff] %vm16_vm5, %v1086_v1  ;;  %vm474_vm6 = vcmp.eq.s32.totalorder %v1432_v31, %v409_v47  ;;  %v990_v0 = vpop.eup %989  ;;  %997 = vpow2.f32 %v229_v32  ;;  %vm478_vm10 = vcmp.eq.s32.totalorder %v1432_v31, %v421_v39  ;;  %v190_v39 = vsub.f32 %v1265_v46, %v1436_v40 }
  0xd2   :  { %33 = vst.msk [vmem:[#allocation2 + $0x80] sm:$0xff] %vm16_vm5, %v1086_v1  ;;  %34 = vst.msk [vmem:[#allocation2 + $0x88] sm:$0xff] %vm16_vm5, %v1086_v1  ;;  %v499_v19 = vsel %vm474_vm6, %v1139_v10, 0.0  ;;  %v187_v10 = vsub.f32 %v1232_v37, %v1417_v60  ;;  %v285_v52 = vsel %vm92_vm0, %v990_v0, 0.0  ;;  %v233_v59 = vmul.f32 1.442695, %v188_v6 }
  0xd3   :  { %35 = vst.msk [vmem:[#allocation2 + $0x90] sm:$0xff] %vm16_vm5, %v1086_v1  ;;  %36 = vst.msk [vmem:[#allocation2 + $0x98] sm:$0xff] %vm16_vm5, %v1086_v1  ;;  %v503_v32 = vsel %vm478_vm10, %v1167_v18, 0.0  ;;  %v191_v18 = vsub.f32 %v1260_v45, %v1430_v20 }
  0xd4   :  { %37 = vst.msk [vmem:[#allocation2 + $0xa0] sm:$0xff] %vm16_vm5, %v1086_v1  ;;  %38 = vst.msk [vmem:[#allocation2 + $0xa8] sm:$0xff] %vm16_vm5, %v1086_v1  ;;  %v424_v15 = vpop.permute.xlu1 %423  ;;  %280 = vadd.xlane.f32.xlu1 %v279_v58  ;;  %530 = vadd.xlane.f32.xlu0 %v529_v16  ;;  %v415_v4 = vpop.permute.xlu0 %414  ;;  %v231_v9 = vmul.f32 1.442695, %v187_v10 }
  0xd5   :  { %39 = vst.msk [vmem:[#allocation2 + $0xb0] sm:$0xff] %vm16_vm5, %v1086_v1  ;;  %40 = vst.msk [vmem:[#allocation2 + $0xb8] sm:$0xff] %vm16_vm5, %v1086_v1  ;;  %vm476_vm8 = vcmp.eq.s32.totalorder %v1432_v31, %v415_v4  ;;  %v992_v58 = vpop.eup %991  ;;  %vm479_vm11 = vcmp.eq.s32.totalorder %v1432_v31, %v424_v15  ;;  %v237_v15 = vmul.f32 1.442695, %v190_v39 }
  0xd6   :  { %41 = vst.msk [vmem:[#allocation2 + $0xc0] sm:$0xff] %vm16_vm5, %v1086_v1  ;;  %v532_v1 = vsel %vm92_vm0, %v499_v19, 0.0  ;;  %v501_v16 = vsel %vm476_vm8, %v1153_v14, 0.0  ;;  %v288_v2 = vsel %vm92_vm0, %v992_v58, 0.0  ;;  %999 = vpow2.f32 %v231_v9 }
  0xd7   :  { %v538_v44 = vsel %vm92_vm0, %v501_v16, 0.0  ;;  %v189_v14 = vsub.f32 %v1246_v41, %v1424_v7  ;;  %1001 = vpow2.f32 %v233_v59  ;;  %v504_v16 = vsel %vm479_vm11, %v1162_v17, 0.0 }
  0xd8   :  { %v427_v47 = vpop.permute.xlu1 %426  ;;  %283 = vadd.xlane.f32.xlu1 %v282_v5  ;;  %533 = vadd.xlane.f32.xlu0 %v532_v1  ;;  %v994_v4 = vpop.eup %993  ;;  %v502_v5 = vsel %vm477_vm9, %v1148_v13, 0.0  ;;  %v239_v17 = vmul.f32 1.442695, %v191_v18 }
  0xd9   :  { %v291_v1 = vsel %vm92_vm0, %v994_v4, 0.0  ;;  %v541_v0 = vsel %vm92_vm0, %v502_v5, 0.0  ;;  %v235_v13 = vmul.f32 1.442695, %v189_v14  ;;  %vm480_vm12 = vcmp.eq.s32.totalorder %v1432_v31, %v427_v47  ;;  %v433_v5 = vpop.permute.xlu0 %432 }
  0xda   :  { %v996_v51 = vpop.eup %995  ;;  %v505_v4 = vsel %vm480_vm12, %v1181_v22, 0.0  ;;  %v192_v47 = vsub.f32 %v1274_v49, %v1443_v3  ;;  %vm482_vm14 = vcmp.eq.s32.totalorder %v1432_v31, %v433_v5 }
  0xdb   :  { %v998_v58 = vpop.eup %997  ;;  %1003 = vpow2.f32 %v235_v13  ;;  %v550_v59 = vsel %vm92_vm0, %v505_v4, 0.0  ;;  %v507_v39 = vsel %vm482_vm14, %v1195_v26, 0.0 }
  0xdc   :  { %286 = vadd.xlane.f32.xlu1 %v285_v52  ;;  %536 = vadd.xlane.f32.xlu0 %v535_v57  ;;  %v430_v19 = vpop.permute.xlu1 %429  ;;  %v294_v52 = vsel %vm92_vm0, %v996_v51, 0.0  ;;  %v544_v57 = vsel %vm92_vm0, %v503_v32, 0.0  ;;  %v297_v6 = vsel %vm92_vm0, %v998_v58, 0.0  ;;  %1005 = vpow2.f32 %v237_v15 }
  0xdd   :  { %vm481_vm13 = vcmp.eq.s32.totalorder %v1432_v31, %v430_v19  ;;  %1007 = vpow2.f32 %v239_v17  ;;  %v241_v22 = vmul.f32 1.442695, %v192_v47 }
  0xde   :  { %v506_v51 = vsel %vm481_vm13, %v1176_v21, 0.0  ;;  %v556_v21 = vsel %vm92_vm0, %v507_v39, 0.0 }
  0xdf   :  { %v553_v32 = vsel %vm92_vm0, %v506_v51, 0.0  ;;  %1009 = vpow2.f32 %v241_v22 }
  0xe0   :  { %289 = vadd.xlane.f32.xlu1 %v288_v2  ;;  %539 = vadd.xlane.f32.xlu0 %v538_v44  ;;  %v436_v10 = vpop.permute.xlu1 %435  ;;  %v547_v2 = vsel %vm92_vm0, %v504_v16, 0.0  ;;  %v1000_v44 = vpop.eup %999 }
  0xe1   :  { %v300_v14 = vsel %vm92_vm0, %v1000_v44, 0.0  ;;  %vm483_vm15 = vcmp.eq.s32.totalorder %v1432_v31, %v436_v10  ;;  %v451_v16 = vpop.permute.xlu0 %450 }
  0xe2   :  { %v508_v18 = vsel %vm483_vm15, %v1190_v25, 0.0  ;;  %vm488_vm3 = vcmp.eq.s32.totalorder %v1432_v31, %v451_v16 }
  0xe3   :  { %v559_v26 = vsel %vm92_vm0, %v508_v18, 0.0 }
  0xe4   :  { %292 = vadd.xlane.f32.xlu1 %v291_v1  ;;  %542 = vadd.xlane.f32.xlu0 %v541_v0  ;;  %v439_v9 = vpop.permute.xlu1 %438  ;;  %v1002_v1 = vpop.eup %1001 }
  0xe5   :  { %v303_v19 = vsel %vm92_vm0, %v1002_v1, 0.0  ;;  %v1004_v13 = vpop.eup %1003  ;;  %vm484_vm1 = vcmp.eq.s32.totalorder %v1432_v31, %v439_v9  ;;  %v457_v44 = vpop.permute.xlu0 %456 }
  0xe6   :  { %v1006_v58 = vpop.eup %1005  ;;  %vm490_vm6 = vcmp.eq.s32.totalorder %v1432_v31, %v457_v44 }
  0xe7   :  { %v309_v15 = vsel %vm92_vm0, %v1006_v58, 0.0  ;;  %v515_v51 = vsel %vm490_vm6, %v1251_v42, 0.0 }
  0xe8   :  { %295 = vadd.xlane.f32.xlu1 %v294_v52  ;;  %545 = vadd.xlane.f32.xlu0 %v544_v57  ;;  %v442_v0 = vpop.permute.xlu1 %441  ;;  %v306_v57 = vsel %vm92_vm0, %v1004_v13, 0.0 }
  0xe9   :  { %vm485_vm2 = vcmp.eq.s32.totalorder %v1432_v31, %v442_v0 }
  0xea   :  { %v510_v9 = vsel %vm485_vm2, %v1204_v29, 0.0 }
  0xec   :  { %298 = vadd.xlane.f32.xlu1 %v297_v6  ;;  %548 = vadd.xlane.f32.xlu0 %v547_v2  ;;  %v445_v52 = vpop.permute.xlu1 %444  ;;  %v1008_v6 = vpop.eup %1007  ;;  %v509_v2 = vsel %vm484_vm1, %v1209_v30, 0.0  ;;  %v565_v30 = vsel %vm92_vm0, %v510_v9, 0.0 }
  0xed   :  { %v312_v4 = vsel %vm92_vm0, %v1008_v6, 0.0  ;;  %v562_v17 = vsel %vm92_vm0, %v509_v2, 0.0  ;;  %v1010_v25 = vpop.eup %1009  ;;  %vm486_vm4 = vcmp.eq.s32.totalorder %v1432_v31, %v445_v52 }
  0xee   :  { %v315_v5 = vsel %vm92_vm0, %v1010_v25, 0.0  ;;  %v511_v1 = vsel %vm486_vm4, %v1223_v34, 0.0  ;;  %v775_v25 = vld [vmem:[#allocation2] sm:$0xff] }
  0xef   :  { %v568_v29 = vsel %vm92_vm0, %v511_v1, 0.0 }
  0xf0   :  { %301 = vadd.xlane.f32.xlu1 %v300_v14  ;;  %551 = vadd.xlane.f32.xlu0 %v550_v59  ;;  %v448_v10 = vpop.permute.xlu1 %447  ;;  %v513_v14 = vsel %vm488_vm3, %v1237_v38, 0.0  ;;  %v463_v59 = vpop.permute.xlu0 %462 }
  0xf1   :  { %vm487_vm7 = vcmp.eq.s32.totalorder %v1432_v31, %v448_v10  ;;  %v574_v0 = vsel %vm92_vm0, %v513_v14, 0.0  ;;  %vm492_vm8 = vcmp.eq.s32.totalorder %v1432_v31, %v463_v59 }
  0xf2   :  { %v512_v38 = vsel %vm487_vm7, %v1218_v33, 0.0  ;;  %v517_v13 = vsel %vm492_vm8, %v1265_v46, 0.0 }
  0xf3   :  { %v586_v52 = vsel %vm92_vm0, %v517_v13, 0.0 }
  0xf4   :  { %304 = vadd.xlane.f32.xlu1 %v303_v19  ;;  %554 = vadd.xlane.f32.xlu0 %v553_v32  ;;  %v454_v47 = vpop.permute.xlu1 %453  ;;  %v469_v34 = vpop.permute.xlu0 %468  ;;  %v571_v19 = vsel %vm92_vm0, %v512_v38, 0.0  ;;  %v580_v32 = vsel %vm92_vm0, %v515_v51, 0.0 }
  0xf5   :  { %vm489_vm9 = vcmp.eq.s32.totalorder %v1432_v31, %v454_v47  ;;  %vm494_vm10 = vcmp.eq.s32.totalorder %v1432_v31, %v469_v34 }
  0xf6   :  { %v514_v42 = vsel %vm489_vm9, %v1232_v37, 0.0 }
  0xf7   :  { %v577_v39 = vsel %vm92_vm0, %v514_v42, 0.0 }
  0xf8   :  { %307 = vadd.xlane.f32.xlu1 %v306_v57  ;;  %557 = vadd.xlane.f32.xlu0 %v556_v21  ;;  %v460_v22 = vpop.permute.xlu1 %459  ;;  %v519_v57 = vsel %vm494_vm10, %v1274_v49, 0.0 }
  0xf9   :  { %vm491_vm11 = vcmp.eq.s32.totalorder %v1432_v31, %v460_v22  ;;  %v592_v37 = vsel %vm92_vm0, %v519_v57, 0.0 }
  0xfa   :  { %v516_v21 = vsel %vm491_vm11, %v1246_v41, 0.0 }
  0xfb   :  { %v583_v46 = vsel %vm92_vm0, %v516_v21, 0.0 }
  0xfc   :  { %310 = vadd.xlane.f32.xlu1 %v309_v15  ;;  %560 = vadd.xlane.f32.xlu0 %v559_v26  ;;  %v466_v33 = vpop.permute.xlu1 %465 }
  0xfd   :  { %vm493_vm12 = vcmp.eq.s32.totalorder %v1432_v31, %v466_v33 }
  0xfe   :  { %v518_v58 = vsel %vm493_vm12, %v1260_v45, 0.0 }
  0xff   :  { %v589_v16 = vsel %vm92_vm0, %v518_v58, 0.0  ;;  %vm938_vm0 = vcmask 0  }
 0x100   :  { %313 = vadd.xlane.f32.xlu1 %v312_v4  ;;  %563 = vadd.xlane.f32.xlu0 %v562_v17 }
 0x104   :  { %316 = vadd.xlane.f32.xlu1 %v315_v5  ;;  %566 = vadd.xlane.f32.xlu0 %v565_v30 }
 0x108   :  { %569 = vadd.xlane.f32.xlu0 %v568_v29  ;;  %575 = vadd.xlane.f32.xlu1 %v574_v0 }
 0x10c   :  { %572 = vadd.xlane.f32.xlu0 %v571_v19  ;;  %581 = vadd.xlane.f32.xlu1 %v580_v32 }
 0x110   :  { %578 = vadd.xlane.f32.xlu0 %v577_v39  ;;  %587 = vadd.xlane.f32.xlu1 %v586_v52  ;;  %v777_v39 = vld [vmem:[#allocation2 + $0x10] sm:$0xff] }
 0x114   :  { %584 = vadd.xlane.f32.xlu0 %v583_v46  ;;  %593 = vadd.xlane.f32.xlu1 %v592_v37 }
 0x118   :  { %590 = vadd.xlane.f32.xlu0 %v589_v16  ;;  %v778_v16 = vld [vmem:[#allocation2 + $0x18] sm:$0xff] }
 0x12e   :  { %v245_v18 = vpop.xlane.xlu1 %244 }
 0x12f   :  { %1011 = vlog2.f32 %v245_v18 }
 0x132   :  { %v254_v49 = vpop.xlane.xlu1 %253 }
 0x133   :  { %v248_v15 = vpop.xlane.xlu0 %247 }
 0x134   :  { %1013 = vlog2.f32 %v248_v15 }
 0x136   :  { %v260_v41 = vpop.xlane.xlu1 %259 }
 0x137   :  { %v251_v26 = vpop.xlane.xlu0 %250 }
 0x138   :  { %1015 = vlog2.f32 %v251_v26 }
 0x139   :  { %v1012_v6 = vpop.eup %1011  ;;  %1017 = vlog2.f32 %v254_v49 }
 0x13a   :  { %v319_v10 = vmul.f32 0.6931472, %v1012_v6  ;;  %v266_v2 = vpop.xlane.xlu1 %265 }
 0x13b   :  { %v257_v31 = vpop.xlane.xlu0 %256 }
 0x13c   :  { %v368_v4 = vadd.f32 %v319_v10, %v1355_v27  ;;  %1019 = vlog2.f32 %v257_v31  ;;  %v776_v27 = vld [vmem:[#allocation2 + $0x8] sm:$0xff]  ;;  %v779_v31 = vld [vmem:[#allocation2 + $0x20] sm:$0xff] }
 0x13d   :  { %1021 = vlog2.f32 %v260_v41 }
 0x13e   :  { %v1014_v45 = vpop.eup %1013 }
 0x13f   :  { %v263_v44 = vpop.xlane.xlu0 %262  ;;  %v321_v47 = vmul.f32 0.6931472, %v1014_v45 }
 0x140   :  { %1023 = vlog2.f32 %v263_v44 }
 0x141   :  { %v369_v29 = vadd.f32 %v321_v47, %v1363_v36  ;;  %1025 = vlog2.f32 %v266_v2 }
 0x142   :  { %v1016_v30 = vpop.eup %1015 }
 0x143   :  { %v269_v14 = vpop.xlane.xlu0 %268  ;;  %v323_v1 = vmul.f32 0.6931472, %v1016_v30  ;;  %v1018_v0 = vpop.eup %1017 }
 0x144   :  { %v325_v34 = vmul.f32 0.6931472, %v1018_v0  ;;  %1027 = vlog2.f32 %v269_v14 }
 0x145   :  { %v370_v32 = vadd.f32 %v323_v1, %v1353_v24 }
 0x146   :  { %v1020_v13 = vpop.eup %1019  ;;  %v371_v21 = vadd.f32 %v325_v34, %v1361_v35 }
 0x147   :  { %v327_v57 = vmul.f32 0.6931472, %v1020_v13  ;;  %v1022_v46 = vpop.eup %1021 }
 0x148   :  { %v329_v24 = vmul.f32 0.6931472, %v1022_v46 }
 0x149   :  { %v372_v49 = vadd.f32 %v327_v57, %v1371_v50 }
 0x14a   :  { %v1024_v26 = vpop.eup %1023  ;;  %v373_v44 = vadd.f32 %v329_v24, %v1369_v48 }
 0x14b   :  { %v331_v35 = vmul.f32 0.6931472, %v1024_v26 }
 0x151   :  { %v522_v17 = vpop.xlane.xlu1 %521 }
 0x152   :  { %v725_v9 = vsub.f32 %v368_v4, %v522_v17  ;;  %v1026_v4 = vpop.eup %1025 }
 0x153   :  { %v333_v50 = vmul.f32 0.6931472, %v1026_v4  ;;  %v1028_v30 = vpop.eup %1027 }
 0x154   :  { %v800_v5 = vadd.f32 %v775_v25, %v725_v9  ;;  %v780_v25 = vld [vmem:[#allocation2 + $0x28] sm:$0xff]  ;;  %v335_v48 = vmul.f32 0.6931472, %v1028_v30 }
 0x155   :  { %v272_v59 = vpop.xlane.xlu1 %271 }
 0x156   :  { %826 = vst.msk [vmem:[#allocation2] sm:$0xff] %vm16_vm5, %v800_v5  ;;  %1029 = vlog2.f32 %v272_v59  ;;  %v374_v5 = vadd.f32 %v331_v35, %v1379_v56  ;;  %v781_v59 = vld [vmem:[#allocation2 + $0x30] sm:$0xff]  ;;  %v376_v13 = vadd.f32 %v335_v48, %v1387_v63 }
 0x159   :  { %v275_v51 = vpop.xlane.xlu1 %274  ;;  %v525_v22 = vpop.xlane.xlu0 %524 }
 0x15a   :  { %v726_v38 = vsub.f32 %v369_v29, %v525_v22  ;;  %1031 = vlog2.f32 %v275_v51  ;;  %v375_v22 = vadd.f32 %v333_v50, %v1377_v55  ;;  %v782_v51 = vld [vmem:[#allocation2 + $0x38] sm:$0xff] }
 0x15c   :  { %v801_v19 = vadd.f32 %v776_v27, %v726_v38 }
 0x15d   :  { %v278_v42 = vpop.xlane.xlu1 %277  ;;  %v528_v33 = vpop.xlane.xlu0 %527 }
 0x15e   :  { %827 = vst.msk [vmem:[#allocation2 + $0x8] sm:$0xff] %vm16_vm5, %v801_v19  ;;  %v727_v52 = vsub.f32 %v370_v32, %v528_v33  ;;  %1033 = vlog2.f32 %v278_v42  ;;  %v783_v42 = vld [vmem:[#allocation2 + $0x40] sm:$0xff] }
 0x160   :  { %v802_v36 = vadd.f32 %v777_v39, %v727_v52  ;;  %v1030_v27 = vpop.eup %1029 }
 0x161   :  { %v281_v37 = vpop.xlane.xlu1 %280  ;;  %v531_v58 = vpop.xlane.xlu0 %530  ;;  %v337_v56 = vmul.f32 0.6931472, %v1030_v27 }
 0x162   :  { %828 = vst.msk [vmem:[#allocation2 + $0x10] sm:$0xff] %vm16_vm5, %v802_v36  ;;  %v728_v18 = vsub.f32 %v371_v21, %v531_v58  ;;  %1035 = vlog2.f32 %v281_v37  ;;  %v784_v37 = vld [vmem:[#allocation2 + $0x48] sm:$0xff] }
 0x163   :  { %v377_v21 = vadd.f32 %v337_v56, %v1385_v62 }
 0x164   :  { %v803_v15 = vadd.f32 %v778_v16, %v728_v18  ;;  %v1032_v33 = vpop.eup %1031 }
 0x165   :  { %v284_v41 = vpop.xlane.xlu1 %283  ;;  %v534_v6 = vpop.xlane.xlu0 %533  ;;  %v339_v55 = vmul.f32 0.6931472, %v1032_v33 }
 0x166   :  { %829 = vst.msk [vmem:[#allocation2 + $0x18] sm:$0xff] %vm16_vm5, %v803_v15  ;;  %v729_v10 = vsub.f32 %v372_v49, %v534_v6  ;;  %1037 = vlog2.f32 %v284_v41  ;;  %v785_v41 = vld [vmem:[#allocation2 + $0x50] sm:$0xff] }
 0x167   :  { %v378_v15 = vadd.f32 %v339_v55, %v1394_v12 }
 0x168   :  { %v804_v2 = vadd.f32 %v779_v31, %v729_v10  ;;  %v1034_v46 = vpop.eup %1033 }
 0x169   :  { %v287_v45 = vpop.xlane.xlu1 %286  ;;  %v537_v17 = vpop.xlane.xlu0 %536  ;;  %v341_v63 = vmul.f32 0.6931472, %v1034_v46 }
 0x16a   :  { %830 = vst.msk [vmem:[#allocation2 + $0x20] sm:$0xff] %vm16_vm5, %v804_v2  ;;  %v730_v9 = vsub.f32 %v373_v44, %v537_v17  ;;  %1039 = vlog2.f32 %v287_v45  ;;  %v855_v44 = vld [vmem:[#allocation2 + $0x8] sm:$0xff]  ;;  %v786_v17 = vld [vmem:[#allocation2 + $0x58] sm:$0xff] }
 0x16b   :  { %v379_v35 = vadd.f32 %v341_v63, %v1392_v11  ;;  %v880_v50 = vsel %vm16_vm5, %v855_v44, 0.0 }
 0x16c   :  { %v805_v47 = vadd.f32 %v780_v25, %v730_v9  ;;  %v1036_v49 = vpop.eup %1035  ;;  %v854_v25 = vld [vmem:[#allocation2] sm:$0xff]  ;;  %v856_v9 = vld [vmem:[#allocation2 + $0x10] sm:$0xff] }
 0x16d   :  { %v290_v14 = vpop.xlane.xlu1 %289  ;;  %v540_v1 = vpop.xlane.xlu0 %539  ;;  %v343_v62 = vmul.f32 0.6931472, %v1036_v49  ;;  %v857_v11 = vld [vmem:[#allocation2 + $0x18] sm:$0xff]  ;;  %v879_v48 = vsel %vm16_vm5, %v854_v25, 0.0 }
 0x16e   :  { %831 = vst.msk [vmem:[#allocation2 + $0x28] sm:$0xff] %vm16_vm5, %v805_v47  ;;  %v731_v29 = vsub.f32 %v374_v5, %v540_v1  ;;  %1041 = vlog2.f32 %v290_v14  ;;  %v881_v27 = vadd.f32 %v880_v50, %v879_v48 }
 0x16f   :  { %v380_v30 = vadd.f32 %v343_v62, %v1400_v28 }
 0x170   :  { %v806_v0 = vadd.f32 %v781_v59, %v731_v29  ;;  %v1038_v2 = vpop.eup %1037  ;;  %v787_v29 = vld [vmem:[#allocation2 + $0x60] sm:$0xff] }
 0x171   :  { %v293_v38 = vpop.xlane.xlu1 %292  ;;  %v543_v34 = vpop.xlane.xlu0 %542  ;;  %v345_v47 = vmul.f32 0.6931472, %v1038_v2 }
 0x172   :  { %832 = vst.msk [vmem:[#allocation2 + $0x30] sm:$0xff] %vm16_vm5, %v806_v0  ;;  %v732_v19 = vsub.f32 %v375_v22, %v543_v34  ;;  %1043 = vlog2.f32 %v293_v38  ;;  %v882_v0 = vsel %vm16_vm5, %v856_v9, 0.0  ;;  %v858_v38 = vld [vmem:[#allocation2 + $0x20] sm:$0xff]  ;;  %v884_v34 = vsel %vm16_vm5, %v857_v11, 0.0  ;;  %v790_v9 = vld [vmem:[#allocation2 + $0x78] sm:$0xff] }
 0x174   :  { %v807_v32 = vadd.f32 %v782_v51, %v732_v19  ;;  %v1040_v14 = vpop.eup %1039  ;;  %v381_v19 = vadd.f32 %v345_v47, %v1398_v23 }
 0x175   :  { %v296_v39 = vpop.xlane.xlu1 %295  ;;  %v546_v52 = vpop.xlane.xlu0 %545  ;;  %v347_v51 = vmul.f32 0.6931472, %v1040_v14 }
 0x176   :  { %833 = vst.msk [vmem:[#allocation2 + $0x38] sm:$0xff] %vm16_vm5, %v807_v32  ;;  %v733_v57 = vsub.f32 %v376_v13, %v546_v52  ;;  %v883_v32 = vadd.f32 %v882_v0, %v881_v27  ;;  %v859_v13 = vld [vmem:[#allocation2 + $0x28] sm:$0xff] }
 0x178   :  { %v808_v36 = vadd.f32 %v783_v42, %v733_v57  ;;  %v1042_v56 = vpop.eup %1041  ;;  %v788_v42 = vld [vmem:[#allocation2 + $0x68] sm:$0xff]  ;;  %v885_v55 = vadd.f32 %v884_v34, %v883_v32 }
 0x179   :  { %v299_v58 = vpop.xlane.xlu1 %298  ;;  %v549_v16 = vpop.xlane.xlu0 %548  ;;  %v349_v46 = vmul.f32 0.6931472, %v1042_v56 }
 0x17a   :  { %834 = vst.msk [vmem:[#allocation2 + $0x40] sm:$0xff] %vm16_vm5, %v808_v36  ;;  %v734_v18 = vsub.f32 %v377_v21, %v549_v16  ;;  %1045 = vlog2.f32 %v299_v58  ;;  %v860_v36 = vld [vmem:[#allocation2 + $0x30] sm:$0xff] }
 0x17b   :  { %1047 = vlog2.f32 %v296_v39  ;;  %v886_v39 = vsel %vm16_vm5, %v858_v38, 0.0  ;;  %v1684_v16 = vld [vmem:[#allocation6_spill] sm:$0xff] }
 0x17c   :  { %v809_v24 = vadd.f32 %v784_v37, %v734_v18  ;;  %v1044_v21 = vpop.eup %1043  ;;  %v382_v23 = vadd.f32 %v347_v51, %v1684_v16  ;;  %v888_v37 = vsel %vm16_vm5, %v859_v13, 0.0  ;;  %v793_v51 = vld [vmem:[#allocation2 + $0x90] sm:$0xff]  ;;  %v795_v16 = vld [vmem:[#allocation2 + $0xa0] sm:$0xff] }
 0x17d   :  { %v302_v26 = vpop.xlane.xlu1 %301  ;;  %v552_v6 = vpop.xlane.xlu0 %551  ;;  %v861_v49 = vld [vmem:[#allocation2 + $0x38] sm:$0xff] }
 0x17e   :  { %835 = vst.msk [vmem:[#allocation2 + $0x48] sm:$0xff] %vm16_vm5, %v809_v24  ;;  %v735_v31 = vsub.f32 %v378_v15, %v552_v6  ;;  %v789_v15 = vld [vmem:[#allocation2 + $0x70] sm:$0xff]  ;;  %v887_v6 = vadd.f32 %v886_v39, %v885_v55 }
 0x180   :  { %v810_v10 = vadd.f32 %v785_v41, %v735_v31  ;;  %v890_v41 = vsel %vm16_vm5, %v860_v36, 0.0  ;;  %v351_v31 = vmul.f32 0.6931472, %v1044_v21 }
 0x181   :  { %v305_v4 = vpop.xlane.xlu1 %304  ;;  %v555_v45 = vpop.xlane.xlu0 %554  ;;  %v862_v62 = vld [vmem:[#allocation2 + $0x40] sm:$0xff] }
 0x182   :  { %836 = vst.msk [vmem:[#allocation2 + $0x50] sm:$0xff] %vm16_vm5, %v810_v10  ;;  %v736_v12 = vsub.f32 %v379_v35, %v555_v45  ;;  %1049 = vlog2.f32 %v305_v4  ;;  %v889_v10 = vadd.f32 %v888_v37, %v887_v6  ;;  %v383_v4 = vadd.f32 %v349_v46, %v1404_v43  ;;  %v792_v37 = vld [vmem:[#allocation2 + $0x88] sm:$0xff] }
 0x183   :  { %1051 = vlog2.f32 %v302_v26  ;;  %v892_v45 = vsel %vm16_vm5, %v861_v49, 0.0  ;;  %v384_v11 = vadd.f32 %v351_v31, %v1412_v54 }
 0x184   :  { %v811_v5 = vadd.f32 %v786_v17, %v736_v12  ;;  %v1046_v18 = vpop.eup %1045  ;;  %v891_v47 = vadd.f32 %v890_v41, %v889_v10 }
 0x185   :  { %v308_v1 = vpop.xlane.xlu1 %307  ;;  %v558_v59 = vpop.xlane.xlu0 %557  ;;  %v355_v2 = vmul.f32 0.6931472, %v1046_v18  ;;  %v863_v50 = vld [vmem:[#allocation2 + $0x48] sm:$0xff] }
 0x186   :  { %837 = vst.msk [vmem:[#allocation2 + $0x58] sm:$0xff] %vm16_vm5, %v811_v5  ;;  %v737_v22 = vsub.f32 %v380_v30, %v558_v59  ;;  %v1048_v35 = vpop.eup %1047  ;;  %v894_v30 = vsel %vm16_vm5, %v862_v62, 0.0  ;;  %v893_v43 = vadd.f32 %v892_v45, %v891_v47  ;;  %v896_v27 = vsel %vm16_vm5, %v863_v50, 0.0  ;;  %v797_v45 = vld [vmem:[#allocation2 + $0xb0] sm:$0xff] }
 0x187   :  { %v353_v14 = vmul.f32 0.6931472, %v1048_v35  ;;  %v386_v0 = vadd.f32 %v355_v2, %v1419_v61 }
 0x188   :  { %v812_v28 = vadd.f32 %v787_v29, %v737_v22  ;;  %v895_v56 = vadd.f32 %v894_v30, %v893_v43 }
 0x189   :  { %v311_v33 = vpop.xlane.xlu1 %310  ;;  %v561_v52 = vpop.xlane.xlu0 %560 }
 0x18a   :  { %838 = vst.msk [vmem:[#allocation2 + $0x60] sm:$0xff] %vm16_vm5, %v812_v28  ;;  %v738_v57 = vsub.f32 %v381_v19, %v561_v52  ;;  %1053 = vlog2.f32 %v311_v33  ;;  %v791_v19 = vld [vmem:[#allocation2 + $0x80] sm:$0xff]  ;;  %v385_v52 = vadd.f32 %v353_v14, %v1410_v53  ;;  %v897_v61 = vadd.f32 %v896_v27, %v895_v56 }
 0x18b   :  { %1055 = vlog2.f32 %v308_v1  ;;  %v864_v1 = vld [vmem:[#allocation2 + $0x50] sm:$0xff] }
 0x18c   :  { %v813_v58 = vadd.f32 %v788_v42, %v738_v57  ;;  %v1050_v17 = vpop.eup %1049  ;;  %v898_v13 = vsel %vm16_vm5, %v864_v1, 0.0 }
 0x18d   :  { %v314_v63 = vpop.xlane.xlu1 %313  ;;  %v564_v24 = vpop.xlane.xlu0 %563  ;;  %v359_v29 = vmul.f32 0.6931472, %v1050_v17  ;;  %v865_v22 = vld [vmem:[#allocation2 + $0x58] sm:$0xff] }
 0x18e   :  { %839 = vst.msk [vmem:[#allocation2 + $0x68] sm:$0xff] %vm16_vm5, %v813_v58  ;;  %v739_v26 = vsub.f32 %v382_v23, %v564_v24  ;;  %v1052_v59 = vpop.eup %1051  ;;  %v900_v39 = vsel %vm16_vm5, %v865_v22, 0.0 }
 0x18f   :  { %v357_v33 = vmul.f32 0.6931472, %v1052_v59  ;;  %v388_v46 = vadd.f32 %v359_v29, %v1426_v8  ;;  %v799_v29 = vld [vmem:[#allocation2 + $0xc0] sm:$0xff] }
 0x190   :  { %v814_v44 = vadd.f32 %v789_v15, %v739_v26 }
 0x191   :  { %v317_v12 = vpop.xlane.xlu1 %316  ;;  %v567_v25 = vpop.xlane.xlu0 %566  ;;  %v866_v42 = vld [vmem:[#allocation2 + $0x60] sm:$0xff]  ;;  %v387_v6 = vadd.f32 %v357_v33, %v1417_v60 }
 0x192   :  { %840 = vst.msk [vmem:[#allocation2 + $0x70] sm:$0xff] %vm16_vm5, %v814_v44  ;;  %1057 = vlog2.f32 %v317_v12  ;;  %v740_v5 = vsub.f32 %v383_v4, %v567_v25  ;;  %v902_v15 = vsel %vm16_vm5, %v866_v42, 0.0  ;;  %v794_v12 = vld [vmem:[#allocation2 + $0x98] sm:$0xff] }
 0x193   :  { %1059 = vlog2.f32 %v314_v63  ;;  %v899_v63 = vadd.f32 %v898_v13, %v897_v61 }
 0x194   :  { %v815_v48 = vadd.f32 %v790_v9, %v740_v5  ;;  %v1054_v38 = vpop.eup %1053 }
 0x195   :  { %v576_v34 = vpop.xlane.xlu1 %575  ;;  %v570_v28 = vpop.xlane.xlu0 %569  ;;  %v363_v55 = vmul.f32 0.6931472, %v1054_v38  ;;  %v867_v18 = vld [vmem:[#allocation2 + $0x68] sm:$0xff]  ;;  %v901_v41 = vadd.f32 %v900_v39, %v899_v63 }
 0x196   :  { %841 = vst.msk [vmem:[#allocation2 + $0x78] sm:$0xff] %vm16_vm5, %v815_v48  ;;  %v743_v32 = vsub.f32 %v386_v0, %v576_v34  ;;  %v741_v54 = vsub.f32 %v384_v11, %v570_v28  ;;  %v1056_v57 = vpop.eup %1055  ;;  %v904_v35 = vsel %vm16_vm5, %v867_v18, 0.0  ;;  %v796_v0 = vld [vmem:[#allocation2 + $0xa8] sm:$0xff] }
 0x197   :  { %v361_v49 = vmul.f32 0.6931472, %v1056_v57  ;;  %v390_v10 = vadd.f32 %v363_v55, %v1436_v40  ;;  %v903_v9 = vadd.f32 %v902_v15, %v901_v41 }
 0x198   :  { %v818_v36 = vadd.f32 %v793_v51, %v743_v32  ;;  %v816_v21 = vadd.f32 %v791_v19, %v741_v54  ;;  %v798_v32 = vld [vmem:[#allocation2 + $0xb8] sm:$0xff] }
 0x199   :  { %v582_v58 = vpop.xlane.xlu1 %581  ;;  %v573_v23 = vpop.xlane.xlu0 %572  ;;  %v868_v26 = vld [vmem:[#allocation2 + $0x70] sm:$0xff]  ;;  %v389_v5 = vadd.f32 %v361_v49, %v1424_v7  ;;  %v905_v30 = vadd.f32 %v904_v35, %v903_v9 }
 0x19a   :  { %844 = vst.msk [vmem:[#allocation2 + $0x90] sm:$0xff] %vm16_vm5, %v818_v36  ;;  %842 = vst.msk [vmem:[#allocation2 + $0x80] sm:$0xff] %vm16_vm5, %v816_v21  ;;  %v745_v53 = vsub.f32 %v388_v46, %v582_v58  ;;  %v742_v24 = vsub.f32 %v385_v52, %v573_v23  ;;  %v906_v47 = vsel %vm16_vm5, %v868_v26, 0.0 }
 0x19b   :  { %v907_v27 = vadd.f32 %v906_v47, %v905_v30 }
 0x19c   :  { %v1058_v8 = vpop.eup %1057  ;;  %v820_v31 = vadd.f32 %v795_v16, %v745_v53  ;;  %v817_v62 = vadd.f32 %v792_v37, %v742_v24 }
 0x19d   :  { %v1060_v2 = vpop.eup %1059  ;;  %v367_v44 = vmul.f32 0.6931472, %v1058_v8  ;;  %v588_v4 = vpop.xlane.xlu1 %587  ;;  %v869_v25 = vld [vmem:[#allocation2 + $0x78] sm:$0xff] }
 0x19e   :  { %v579_v17 = vpop.xlane.xlu0 %578  ;;  %846 = vst.msk [vmem:[#allocation2 + $0xa0] sm:$0xff] %vm16_vm5, %v820_v31  ;;  %843 = vst.msk [vmem:[#allocation2 + $0x88] sm:$0xff] %vm16_vm5, %v817_v62  ;;  %v747_v60 = vsub.f32 %v390_v10, %v588_v4  ;;  %v365_v14 = vmul.f32 0.6931472, %v1060_v2  ;;  %v908_v43 = vsel %vm16_vm5, %v869_v25, 0.0 }
 0x19f   :  { %v744_v50 = vsub.f32 %v387_v6, %v579_v17  ;;  %v392_v40 = vadd.f32 %v367_v44, %v1443_v3  ;;  %v909_v34 = vadd.f32 %v908_v43, %v907_v27 }
 0x1a0   :  { %v822_v11 = vadd.f32 %v797_v45, %v747_v60  ;;  %v391_v19 = vadd.f32 %v365_v14, %v1430_v20 }
 0x1a1   :  { %v819_v1 = vadd.f32 %v794_v12, %v744_v50  ;;  %v594_v59 = vpop.xlane.xlu1 %593  ;;  %v870_v22 = vld [vmem:[#allocation2 + $0x80] sm:$0xff]  ;;  %v872_v13 = vld [vmem:[#allocation2 + $0x90] sm:$0xff] }
 0x1a2   :  { %v585_v48 = vpop.xlane.xlu0 %584  ;;  %848 = vst.msk [vmem:[#allocation2 + $0xb0] sm:$0xff] %vm16_vm5, %v822_v11  ;;  %v749_v38 = vsub.f32 %v392_v40, %v594_v59  ;;  %v910_v7 = vsel %vm16_vm5, %v870_v22, 0.0  ;;  %v914_v57 = vsel %vm16_vm5, %v872_v13, 0.0 }
 0x1a3   :  { %845 = vst.msk [vmem:[#allocation2 + $0x98] sm:$0xff] %vm16_vm5, %v819_v1  ;;  %v746_v3 = vsub.f32 %v389_v5, %v585_v48  ;;  %v911_v33 = vadd.f32 %v910_v7, %v909_v34 }
 0x1a4   :  { %v824_v51 = vadd.f32 %v799_v29, %v749_v38 }
 0x1a5   :  { %v821_v28 = vadd.f32 %v796_v0, %v746_v3  ;;  %v871_v54 = vld [vmem:[#allocation2 + $0x88] sm:$0xff]  ;;  %v874_v36 = vld [vmem:[#allocation2 + $0xa0] sm:$0xff] }
 0x1a6   :  { %v591_v56 = vpop.xlane.xlu0 %590  ;;  %850 = vst.msk [vmem:[#allocation2 + $0xc0] sm:$0xff] %vm16_vm5, %v824_v51  ;;  %v912_v42 = vsel %vm16_vm5, %v871_v54, 0.0  ;;  %v918_v58 = vsel %vm16_vm5, %v874_v36, 0.0 }
 0x1a7   :  { %847 = vst.msk [vmem:[#allocation2 + $0xa8] sm:$0xff] %vm16_vm5, %v821_v28  ;;  %v748_v52 = vsub.f32 %v391_v19, %v591_v56  ;;  %v913_v61 = vadd.f32 %v912_v42, %v911_v33 }
 0x1a9   :  { %v823_v39 = vadd.f32 %v798_v32, %v748_v52  ;;  %v915_v21 = vadd.f32 %v914_v57, %v913_v61  ;;  %v876_v23 = vld [vmem:[#allocation2 + $0xb0] sm:$0xff] }
 0x1aa   :  { %v873_v55 = vld [vmem:[#allocation2 + $0x98] sm:$0xff]  ;;  %v922_v53 = vsel %vm16_vm5, %v876_v23, 0.0 }
 0x1ab   :  { %849 = vst.msk [vmem:[#allocation2 + $0xb8] sm:$0xff] %vm16_vm5, %v823_v39  ;;  %v916_v20 = vsel %vm16_vm5, %v873_v55, 0.0 }
 0x1ac   :  { %v917_v46 = vadd.f32 %v916_v20, %v915_v21 }
 0x1ad   :  { %v878_v15 = vld [vmem:[#allocation2 + $0xc0] sm:$0xff] }
 0x1ae   :  { %v875_v16 = vld [vmem:[#allocation2 + $0xa8] sm:$0xff]  ;;  %v919_v37 = vadd.f32 %v918_v58, %v917_v46  ;;  %v926_v41 = vsel %vm16_vm5, %v878_v15, 0.0 }
 0x1af   :  { %v920_v18 = vsel %vm16_vm5, %v875_v16, 0.0 }
 0x1b0   :  { %v921_v63 = vadd.f32 %v920_v18, %v919_v37 }
 0x1b2   :  { %v877_v24 = vld [vmem:[#allocation2 + $0xb8] sm:$0xff]  ;;  %v923_v49 = vadd.f32 %v922_v53, %v921_v63 }
 0x1b3   :  { %v924_v6 = vsel %vm16_vm5, %v877_v24, 0.0 }
 0x1b4   :  { %v925_v26 = vadd.f32 %v924_v6, %v923_v49 }
 0x1b6   :  { %v927_v8 = vadd.f32 %v926_v41, %v925_v26 }
 0x1b8   :  { %928 = vadd.xlane.f32.xlu0 %v927_v8 }
 0x245   :  { %v929_v31 = vpop.xlane.xlu0 %928 }
 0x246   :  { %v930_v62 = vrot.slane %v929_v31, 4 }
 0x248   :  { %v931_v10 = vadd.f32 %v930_v62, %v929_v31 }
 0x24a   :  { %v932_v35 = vrot.slane %v931_v10, 2 }
 0x24c   :  { %v933_v2 = vadd.f32 %v932_v35, %v931_v10 }
 0x24e   :  { %v934_v44 = vrot.slane %v933_v2, 1 }
 0x250   :  { %v935_v4 = vadd.f32 %v934_v44, %v933_v2 }
 0x252   :  { %954 = vpush %v935_v4 }
 0x283   :  { %s955_s24 = spop %954 }
 0x284   :  { %v937_v45 = vstv %s955_s24 }
 0x285   :  { %939 = vst.msk [vmem:[#allocation3] sm:$0x1] %vm938_vm0, %v937_v45 }
 0x286   :  { %1072 = shalt.err (!%p1069_p4)
}
 0x287   :  { %s1073_s29 = scalar_lea.hbm %s1681_s2, 16 }
 0x288   :  { %p1074_p5 = scmp.ne.s32.totalorder %s1681_s2, %s1073_s29  ;;  %p1077_p6 = scmp.lt.u32.totalorder %s1073_s29, %s1681_s2 }
 0x28a   :  { %p1079_p7 = pnand %p1077_p6, %p1074_p5 }
 0x28c   :  { %1082 = shalt.err (!%p1079_p7)
}
 0x28d   :  { %949 = dma.vmem_to_hbm [thread:$0]  %s947_s23, 16, %s1681_s2, [#allocation4]  }
 0x28e   :  { %1083 = dma.done.wait [#allocation4], 16  }
 0x28f   :  { %1084 = vsyncadd [#allocation4], 4294967280 }
 0x290   :  { %953 = vsyncpa [#allocation4], 1 }

</bundles_post_ra>
